<compile_context>
chip_gen: v5e
topology: v5e:2x2
jax: 0.10.0
libtpu: 0.0.40
codegen_flags: <defaults>
</compile_context>

<pallas_src>
import functools

import jax
import jax.numpy as jnp
from jax.experimental import pallas as pl
from jax.experimental.pallas import tpu as pltpu

EMB = 32                 # embedding_dim
NUM_GNN_LAYERS = 3       # num_layers
OUT_W = 128              # lane-dense output slab width


def _r8(n):
    return -(-n // 8) * 8


# ------------------------------ Pallas kernel ------------------------------ #

def _critic_kernel(curr_ref,
                   v_x_ref, v_adj_ref, v_dinv_ref,
                   p_x_ref, p_adj_ref, p_dinv_ref,
                   w_ref, out_ref, *, num_layers, offs, emb):
    f32 = jnp.float32
    E = emb
    b = pl.program_id(0)

    def encode(x, adj_bf16, dinv, wi_off, bi_off, wg_off, bg_off, att_off):
        N, F = x.shape
        # 0/1 adjacency is exact in bf16; single cast reused across all layers.
        adj = adj_bf16.astype(f32)

        wi = w_ref[wi_off:wi_off + F, :]
        bi = w_ref[bi_off:bi_off + 1, :]
        h0 = jnp.dot(x, wi, preferred_element_type=f32) + bi       # [N, E]

        h = h0
        for l in range(num_layers):
            # Folded GCN normalization: D^-1/2 (A+I) D^-1/2 h
            #   == dinv * (A @ (dinv*h) + dinv*h)
            s = dinv * h
            t = jnp.dot(adj, s, preferred_element_type=f32) + s
            prop = dinv * t
            wg = w_ref[wg_off + l * E: wg_off + (l + 1) * E, :]
            bg = w_ref[bg_off + l * 8: bg_off + l * 8 + 1, :]
            h = jnp.dot(prop, wg, preferred_element_type=f32) + bg
            if l < num_layers - 1:
                h = jnp.maximum(h, 0.0)
        node_emb = h                                                # [N, E]

        # GraphPooling('mean') + GraphPooling('att')
        # (attention projection applied to the pooled mean).
        mean_g = jnp.mean(node_emb, axis=0, keepdims=True)          # [1, E]
        w_att = w_ref[att_off:att_off + E, :]
        t_g = jnp.tanh(jnp.dot(mean_g, w_att, preferred_element_type=f32))
        coefs = jax.nn.sigmoid(
            jnp.sum(node_emb * t_g, axis=-1, keepdims=True))        # [N, 1]
        att_g = jnp.sum(coefs * node_emb, axis=0, keepdims=True)    # [1, E]
        g = mean_g + att_g                                          # [1, E]
        fused = node_emb + g + h0                                   # [N, E]
        return g, fused

    v_g, v_fused = encode(v_x_ref[...], v_adj_ref[...], v_dinv_ref[...],
                          offs["v_wi"], offs["v_bi"], offs["v_wg"],
                          offs["v_bg"], offs["v_att"])
    _p_g, p_fused = encode(p_x_ref[...], p_adj_ref[...], p_dinv_ref[...],
                           offs["p_wi"], offs["p_bi"], offs["p_wg"],
                           offs["p_bg"], offs["p_att"])

    NV = v_fused.shape[0]

    # Gather the current v-node row: scalar id from SMEM, single compare.
    cur_id = curr_ref[b]
    node_iota = jax.lax.broadcasted_iota(jnp.int32, (NV, 1), 0)
    sel = (node_iota == cur_id).astype(f32)                         # [NV, 1]
    curr_v_emb = jnp.sum(sel * v_fused, axis=0, keepdims=True)      # [1, E]

    # Critic head: Linear -> ReLU -> Linear -> mean over p-nodes.
    w1 = w_ref[offs["w1"]:offs["w1"] + E, :]
    b1 = w_ref[offs["b1"]:offs["b1"] + 1, :]
    w2 = w_ref[offs["w2"]:offs["w2"] + 1, :]
    fused_head = p_fused + v_g + curr_v_emb                         # [NP, E]
    hid = jnp.maximum(
        jnp.dot(fused_head, w1, preferred_element_type=f32) + b1, 0.0)
    hid_mean = jnp.mean(hid, axis=0, keepdims=True)                 # [1, E]
    # mean_p(h @ w2 + b2) == mean_p(h) @ w2 + b2 ; b2 folded in the wrapper.
    value = jnp.sum(hid_mean * w2, axis=-1, keepdims=True)          # [1, 1]
    out_ref[...] = jnp.broadcast_to(value, out_ref.shape)           # lane-dense


# --------------------------- weight slab packing ---------------------------- #

def _pack_weights(params, fvp, fpp, emb, num_layers):
    segs, offs = [], {}
    cursor = 0

    def add(name, mat, rows_pad):
        nonlocal cursor
        mat = mat.astype(jnp.float32)
        rows = mat.shape[0]
        if rows_pad > rows:
            mat = jnp.concatenate(
                [mat, jnp.zeros((rows_pad - rows, emb), jnp.float32)], axis=0)
        offs[name] = cursor
        segs.append(mat)
        cursor += rows_pad

    for tag, enc, fp in (("v", params["v_enc"], fvp),
                         ("p", params["p_enc"], fpp)):
        add(f"{tag}_wi", enc["w_init"], fp)                     # [fp, E]
        add(f"{tag}_bi", enc["b_init"].reshape(1, emb), 8)
        add(f"{tag}_wg", enc["w_gcn"].reshape(num_layers * emb, emb),
            num_layers * emb)
        bg = enc["b_gcn"].reshape(num_layers, emb)              # 8-row aligned
        bg = jnp.pad(bg[:, None, :], ((0, 0), (0, 7), (0, 0))).reshape(
            num_layers * 8, emb)
        add(f"{tag}_bg", bg, num_layers * 8)
        add(f"{tag}_att", enc["w_att"], emb)
    hp = params["head"]
    add("w1", hp["w1"], emb)
    add("b1", hp["b1"].reshape(1, emb), 8)
    add("w2", hp["w2"].reshape(1, emb), 8)
    return jnp.concatenate(segs, axis=0), offs


# ------------------------------ JAX wrapper -------------------------------- #

def critic_forward(params, v_x, v_adj, p_x, p_adj, curr_v_node_id):
    B, NV, FV = v_x.shape
    _, NP_, FP = p_x.shape
    E, L = EMB, NUM_GNN_LAYERS
    FVp, FPp = _r8(FV), _r8(FP)

    def pad_feat(x, to):
        if x.shape[-1] == to:
            return x.astype(jnp.float32)
        return jnp.pad(x.astype(jnp.float32),
                       ((0, 0), (0, 0), (0, to - x.shape[-1])))

    v_xp = pad_feat(v_x, FVp)
    p_xp = pad_feat(p_x, FPp)

    # Wrapper-precomputed D^-1/2 with self-loop (deg+1 >= 1, no zero guard).
    v_dinv = jax.lax.rsqrt(jnp.sum(v_adj.astype(jnp.float32), -1,
                                   keepdims=True) + 1.0)
    p_dinv = jax.lax.rsqrt(jnp.sum(p_adj.astype(jnp.float32), -1,
                                   keepdims=True) + 1.0)

    # bf16 adjacency: 0/1 values exact; halves HBM traffic + VMEM block bytes.
    v_adj_b = v_adj.astype(jnp.bfloat16)
    p_adj_b = p_adj.astype(jnp.bfloat16)

    wslab, offs = _pack_weights(params, FVp, FPp, E, L)
    R = wslab.shape[0]

    in_specs = [
        pl.BlockSpec((None, NV, FVp), lambda b, c: (b, 0, 0)),
        pl.BlockSpec((None, NV, NV), lambda b, c: (b, 0, 0)),
        pl.BlockSpec((None, NV, 1), lambda b, c: (b, 0, 0)),
        pl.BlockSpec((None, NP_, FPp), lambda b, c: (b, 0, 0)),
        pl.BlockSpec((None, NP_, NP_), lambda b, c: (b, 0, 0)),
        pl.BlockSpec((None, NP_, 1), lambda b, c: (b, 0, 0)),
        pl.BlockSpec((R, E), lambda b, c: (0, 0)),
    ]
    out_spec = pl.BlockSpec((None, 1, OUT_W), lambda b, c: (b, 0, 0))

    # Explicit scoped-VMEM budget sized from the actual block footprint
    # (x2 double-buffering + in-kernel f32 adjacency copies + headroom).
    block_bytes = (NV * FVp * 4 + NV * NV * 2 + NV * 4 +
                   NP_ * FPp * 4 + NP_ * NP_ * 2 + NP_ * 4 +
                   R * E * 4 + OUT_W * 4)
    vmem_limit = int(min(48 * 1024 * 1024,
                         max(8 * 1024 * 1024,
                             4 * block_bytes + 2 * 1024 * 1024)))

    kern = functools.partial(_critic_kernel, num_layers=L, offs=offs, emb=E)
    out = pl.pallas_call(
        kern,
        out_shape=jax.ShapeDtypeStruct((B, 1, OUT_W), jnp.float32),
        grid_spec=pltpu.PrefetchScalarGridSpec(
            num_scalar_prefetch=1,
            grid=(B,),
            in_specs=in_specs,
            out_specs=out_spec,
        ),
        compiler_params=pltpu.CompilerParams(
            dimension_semantics=("parallel",),
            vmem_limit_bytes=vmem_limit),
    )(curr_v_node_id.astype(jnp.int32),
      v_xp, v_adj_b, v_dinv, p_xp, p_adj_b, p_dinv, wslab)

    # [B, 1, OUT_W] slab -> [B, 1]; fold b2 here.
    return out[:, 0, :1] + params["head"]["b2"].reshape(1, 1)


# ------------------------------ parameter init ----------------------------- #

def _uniform(key, shape, fan):
    stdv = 1.0 / (fan ** 0.5)
    return jax.random.uniform(key, shape, jnp.float32, -stdv, stdv)


def init_encoder_params(key, feat_dim, emb=EMB, num_layers=NUM_GNN_LAYERS):
    ks = jax.random.split(key, 3 + num_layers)
    return {
        "w_init": _uniform(ks[0], (feat_dim, emb), feat_dim),
        "b_init": jnp.zeros((1, emb), jnp.float32),
        "w_gcn": jnp.stack([_uniform(ks[3 + l], (emb, emb), emb)
                            for l in range(num_layers)]),
        "b_gcn": jnp.zeros((num_layers, 1, emb), jnp.float32),
        "w_att": _uniform(ks[1], (emb, emb), emb),
    }


def init_params(key, v_x_dim, p_x_dim, emb=EMB):
    kv, kp, k1, k2 = jax.random.split(key, 4)
    return {
        "v_enc": init_encoder_params(kv, v_x_dim, emb),
        "p_enc": init_encoder_params(kp, p_x_dim, emb),
        "head": {
            "w1": _uniform(k1, (emb, emb), emb),
            "b1": jnp.zeros((1, emb), jnp.float32),
            "w2": _uniform(k2, (emb, 1), emb),
            "b2": jnp.zeros((1, 1), jnp.float32),
        },
    }


# ---------------------------------- main ----------------------------------- #

def _random_adj(key, B, N):
    a = jax.random.uniform(key, (B, N, N))
    a = (a + jnp.swapaxes(a, 1, 2)) / 2.0
    adj = (a > 0.5).astype(jnp.float32)
    return adj * (1.0 - jnp.eye(N, dtype=jnp.float32))


if __name__ == "__main__":
    key = jax.random.PRNGKey(0)
    B, NV, NP_ = 2, 8, 16
    V_X_DIM, P_X_DIM = 6, 8

    k_params, k_vx, k_px, k_va, k_pa, k_id = jax.random.split(key, 6)
    params = init_params(k_params, V_X_DIM, P_X_DIM)

    v_x = jax.random.normal(k_vx, (B, NV, V_X_DIM), jnp.float32)
    p_x = jax.random.normal(k_px, (B, NP_, P_X_DIM), jnp.float32)
    v_adj = _random_adj(k_va, B, NV)
    p_adj = _random_adj(k_pa, B, NP_)
    curr_v_node_id = jax.random.randint(k_id, (B,), 0, NV)

    out = jax.jit(critic_forward)(params, v_x, v_adj, p_x, p_adj,
                                  curr_v_node_id)
    out = jax.block_until_ready(out)
    assert out.shape == (B, 1) and out.dtype == jnp.float32
    print("KERNEL_OK")
</pallas_src>

<mosaic_0001>
module attributes {stable_mosaic.version = 11 : i64} {
  func.func @_critic_kernel(%arg0: i32, %arg1: memref<2xi32, #tpu.memory_space<smem>>, %arg2: memref<1x8x8xf32, #tpu.memory_space<vmem>>, %arg3: memref<1x8x8xbf16, #tpu.memory_space<vmem>>, %arg4: memref<1x8x1xf32, #tpu.memory_space<vmem>>, %arg5: memref<1x16x8xf32, #tpu.memory_space<vmem>>, %arg6: memref<1x16x16xbf16, #tpu.memory_space<vmem>>, %arg7: memref<1x16x1xf32, #tpu.memory_space<vmem>>, %arg8: memref<384x32xf32, #tpu.memory_space<vmem>>, %arg9: memref<1x1x128xf32, #tpu.memory_space<vmem>>) attributes {dimension_semantics = [#tpu.dimension_semantics<parallel>], iteration_bounds = array<i64: 2>, scalar_prefetch = 1 : i64, scratch_operands = 0 : i64, tpu.core_type = #tpu.core_type<tc>, window_params = [{transform_indices = @transform_0, window_bounds = array<i64: 1, 8, 8>}, {transform_indices = @transform_1, window_bounds = array<i64: 1, 8, 8>}, {transform_indices = @transform_2, window_bounds = array<i64: 1, 8, 1>}, {transform_indices = @transform_3, window_bounds = array<i64: 1, 16, 8>}, {transform_indices = @transform_4, window_bounds = array<i64: 1, 16, 16>}, {transform_indices = @transform_5, window_bounds = array<i64: 1, 16, 1>}, {pipeline_mode = #tpu.pipeline_mode<synchronous>, transform_indices = @transform_6, window_bounds = array<i64: 384, 32>}, {transform_indices = @transform_7, window_bounds = array<i64: 1, 1, 128>}]} {
    %c0 = arith.constant 0 : index
    %c0_0 = arith.constant 0 : index
    %c0_1 = arith.constant 0 : index
    %0 = vector.load %arg2[%c0, %c0_0, %c0_1] : memref<1x8x8xf32, #tpu.memory_space<vmem>>, vector<1x8x8xf32>
    %1 = vector.shape_cast %0 : vector<1x8x8xf32> to vector<8x8xf32>
    %c0_2 = arith.constant 0 : index
    %c0_3 = arith.constant 0 : index
    %c0_4 = arith.constant 0 : index
    %2 = vector.load %arg3[%c0_2, %c0_3, %c0_4] : memref<1x8x8xbf16, #tpu.memory_space<vmem>>, vector<1x8x8xbf16>
    %3 = vector.shape_cast %2 : vector<1x8x8xbf16> to vector<8x8xbf16>
    %c0_5 = arith.constant 0 : index
    %c0_6 = arith.constant 0 : index
    %c0_7 = arith.constant 0 : index
    %4 = vector.load %arg4[%c0_5, %c0_6, %c0_7] : memref<1x8x1xf32, #tpu.memory_space<vmem>>, vector<1x8x1xf32>
    %5 = vector.shape_cast %4 : vector<1x8x1xf32> to vector<8x1xf32>
    %6 = arith.extf %3 : vector<8x8xbf16> to vector<8x8xf32>
    %c0_8 = arith.constant 0 : index
    %c0_9 = arith.constant 0 : index
    %7 = vector.load %arg8[%c0_8, %c0_9] : memref<384x32xf32, #tpu.memory_space<vmem>>, vector<8x32xf32>
    %c8 = arith.constant 8 : index
    %c0_10 = arith.constant 0 : index
    %8 = vector.load %arg8[%c8, %c0_10] : memref<384x32xf32, #tpu.memory_space<vmem>>, vector<1x32xf32>
    %cst = arith.constant dense<0.000000e+00> : vector<8x32xf32>
    %9 = tpu.matmul %1, %7, %cst {dimension_numbers = #tpu.dot_dimension_numbers<[1], [0], [0], [1], [0, 0, 1, 1], [], []>} : vector<8x8xf32>, vector<8x32xf32>, vector<8x32xf32> -> vector<8x32xf32>
    %10 = vector.broadcast %8 : vector<1x32xf32> to vector<8x32xf32>
    %11 = arith.addf %9, %10 : vector<8x32xf32>
    %12 = vector.broadcast %5 : vector<8x1xf32> to vector<8x32xf32>
    %13 = arith.mulf %12, %11 : vector<8x32xf32>
    %cst_11 = arith.constant dense<0.000000e+00> : vector<8x32xf32>
    %14 = tpu.matmul %6, %13, %cst_11 {dimension_numbers = #tpu.dot_dimension_numbers<[1], [0], [0], [1], [0, 0, 1, 1], [], []>} : vector<8x8xf32>, vector<8x32xf32>, vector<8x32xf32> -> vector<8x32xf32>
    %15 = arith.addf %14, %13 : vector<8x32xf32>
    %16 = vector.broadcast %5 : vector<8x1xf32> to vector<8x32xf32>
    %17 = arith.mulf %16, %15 : vector<8x32xf32>
    %c16 = arith.constant 16 : index
    %c0_12 = arith.constant 0 : index
    %18 = vector.load %arg8[%c16, %c0_12] : memref<384x32xf32, #tpu.memory_space<vmem>>, vector<32x32xf32>
    %c112 = arith.constant 112 : index
    %c0_13 = arith.constant 0 : index
    %19 = vector.load %arg8[%c112, %c0_13] : memref<384x32xf32, #tpu.memory_space<vmem>>, vector<1x32xf32>
    %cst_14 = arith.constant dense<0.000000e+00> : vector<8x32xf32>
    %20 = tpu.matmul %17, %18, %cst_14 {dimension_numbers = #tpu.dot_dimension_numbers<[1], [0], [0], [1], [0, 0, 1, 1], [], []>} : vector<8x32xf32>, vector<32x32xf32>, vector<8x32xf32> -> vector<8x32xf32>
    %21 = vector.broadcast %19 : vector<1x32xf32> to vector<8x32xf32>
    %22 = arith.addf %20, %21 : vector<8x32xf32>
    %cst_15 = arith.constant 0.000000e+00 : f32
    %23 = vector.broadcast %cst_15 : f32 to vector<8x32xf32>
    %24 = arith.maximumf %22, %23 : vector<8x32xf32>
    %25 = vector.broadcast %5 : vector<8x1xf32> to vector<8x32xf32>
    %26 = arith.mulf %25, %24 : vector<8x32xf32>
    %cst_16 = arith.constant dense<0.000000e+00> : vector<8x32xf32>
    %27 = tpu.matmul %6, %26, %cst_16 {dimension_numbers = #tpu.dot_dimension_numbers<[1], [0], [0], [1], [0, 0, 1, 1], [], []>} : vector<8x8xf32>, vector<8x32xf32>, vector<8x32xf32> -> vector<8x32xf32>
    %28 = arith.addf %27, %26 : vector<8x32xf32>
    %29 = vector.broadcast %5 : vector<8x1xf32> to vector<8x32xf32>
    %30 = arith.mulf %29, %28 : vector<8x32xf32>
    %c48 = arith.constant 48 : index
    %c0_17 = arith.constant 0 : index
    %31 = vector.load %arg8[%c48, %c0_17] : memref<384x32xf32, #tpu.memory_space<vmem>>, vector<32x32xf32>
    %c120 = arith.constant 120 : index
    %c0_18 = arith.constant 0 : index
    %32 = vector.load %arg8[%c120, %c0_18] : memref<384x32xf32, #tpu.memory_space<vmem>>, vector<1x32xf32>
    %cst_19 = arith.constant dense<0.000000e+00> : vector<8x32xf32>
    %33 = tpu.matmul %30, %31, %cst_19 {dimension_numbers = #tpu.dot_dimension_numbers<[1], [0], [0], [1], [0, 0, 1, 1], [], []>} : vector<8x32xf32>, vector<32x32xf32>, vector<8x32xf32> -> vector<8x32xf32>
    %34 = vector.broadcast %32 : vector<1x32xf32> to vector<8x32xf32>
    %35 = arith.addf %33, %34 : vector<8x32xf32>
    %cst_20 = arith.constant 0.000000e+00 : f32
    %36 = vector.broadcast %cst_20 : f32 to vector<8x32xf32>
    %37 = arith.maximumf %35, %36 : vector<8x32xf32>
    %38 = vector.broadcast %5 : vector<8x1xf32> to vector<8x32xf32>
    %39 = arith.mulf %38, %37 : vector<8x32xf32>
    %cst_21 = arith.constant dense<0.000000e+00> : vector<8x32xf32>
    %40 = tpu.matmul %6, %39, %cst_21 {dimension_numbers = #tpu.dot_dimension_numbers<[1], [0], [0], [1], [0, 0, 1, 1], [], []>} : vector<8x8xf32>, vector<8x32xf32>, vector<8x32xf32> -> vector<8x32xf32>
    %41 = arith.addf %40, %39 : vector<8x32xf32>
    %42 = vector.broadcast %5 : vector<8x1xf32> to vector<8x32xf32>
    %43 = arith.mulf %42, %41 : vector<8x32xf32>
    %c80 = arith.constant 80 : index
    %c0_22 = arith.constant 0 : index
    %44 = vector.load %arg8[%c80, %c0_22] : memref<384x32xf32, #tpu.memory_space<vmem>>, vector<32x32xf32>
    %c128 = arith.constant 128 : index
    %c0_23 = arith.constant 0 : index
    %45 = vector.load %arg8[%c128, %c0_23] : memref<384x32xf32, #tpu.memory_space<vmem>>, vector<1x32xf32>
    %cst_24 = arith.constant dense<0.000000e+00> : vector<8x32xf32>
    %46 = tpu.matmul %43, %44, %cst_24 {dimension_numbers = #tpu.dot_dimension_numbers<[1], [0], [0], [1], [0, 0, 1, 1], [], []>} : vector<8x32xf32>, vector<32x32xf32>, vector<8x32xf32> -> vector<8x32xf32>
    %47 = vector.broadcast %45 : vector<1x32xf32> to vector<8x32xf32>
    %48 = arith.addf %46, %47 : vector<8x32xf32>
    %cst_25 = arith.constant dense<0.000000e+00> : vector<32xf32>
    %49 = vector.multi_reduction <add>, %48, %cst_25 [0] : vector<8x32xf32> to vector<32xf32>
    %50 = vector.shape_cast %49 : vector<32xf32> to vector<1x32xf32>
    %cst_26 = arith.constant 8.000000e+00 : f32
    %51 = vector.broadcast %cst_26 : f32 to vector<1x32xf32>
    %52 = arith.divf %50, %51 : vector<1x32xf32>
    %c136 = arith.constant 136 : index
    %c0_27 = arith.constant 0 : index
    %53 = vector.load %arg8[%c136, %c0_27] : memref<384x32xf32, #tpu.memory_space<vmem>>, vector<32x32xf32>
    %cst_28 = arith.constant dense<0.000000e+00> : vector<1x32xf32>
    %54 = tpu.matmul %52, %53, %cst_28 {dimension_numbers = #tpu.dot_dimension_numbers<[1], [0], [0], [1], [0, 0, 1, 1], [], []>} : vector<1x32xf32>, vector<32x32xf32>, vector<1x32xf32> -> vector<1x32xf32>
    %55 = math.tanh %54 : vector<1x32xf32>
    %56 = vector.broadcast %55 : vector<1x32xf32> to vector<8x32xf32>
    %57 = arith.mulf %48, %56 : vector<8x32xf32>
    %cst_29 = arith.constant dense<0.000000e+00> : vector<8xf32>
    %58 = vector.multi_reduction <add>, %57, %cst_29 [1] : vector<8x32xf32> to vector<8xf32>
    %59 = vector.shape_cast %58 : vector<8xf32> to vector<8x1xf32>
    %60 = arith.negf %59 : vector<8x1xf32>
    %61 = math.exp %60 : vector<8x1xf32>
    %cst_30 = arith.constant 1.000000e+00 : f32
    %62 = vector.broadcast %cst_30 : f32 to vector<8x1xf32>
    %63 = arith.addf %62, %61 : vector<8x1xf32>
    %64 = arith.divf %62, %63 : vector<8x1xf32>
    %65 = vector.broadcast %64 : vector<8x1xf32> to vector<8x32xf32>
    %66 = arith.mulf %65, %48 : vector<8x32xf32>
    %cst_31 = arith.constant dense<0.000000e+00> : vector<32xf32>
    %67 = vector.multi_reduction <add>, %66, %cst_31 [0] : vector<8x32xf32> to vector<32xf32>
    %68 = vector.shape_cast %67 : vector<32xf32> to vector<1x32xf32>
    %69 = arith.addf %52, %68 : vector<1x32xf32>
    %70 = vector.broadcast %69 : vector<1x32xf32> to vector<8x32xf32>
    %71 = arith.addf %48, %70 : vector<8x32xf32>
    %72 = arith.addf %71, %11 : vector<8x32xf32>
    %c0_32 = arith.constant 0 : index
    %c0_33 = arith.constant 0 : index
    %c0_34 = arith.constant 0 : index
    %73 = vector.load %arg5[%c0_32, %c0_33, %c0_34] : memref<1x16x8xf32, #tpu.memory_space<vmem>>, vector<1x16x8xf32>
    %74 = vector.shape_cast %73 : vector<1x16x8xf32> to vector<16x8xf32>
    %c0_35 = arith.constant 0 : index
    %c0_36 = arith.constant 0 : index
    %c0_37 = arith.constant 0 : index
    %75 = vector.load %arg6[%c0_35, %c0_36, %c0_37] : memref<1x16x16xbf16, #tpu.memory_space<vmem>>, vector<1x16x16xbf16>
    %76 = vector.shape_cast %75 : vector<1x16x16xbf16> to vector<16x16xbf16>
    %c0_38 = arith.constant 0 : index
    %c0_39 = arith.constant 0 : index
    %c0_40 = arith.constant 0 : index
    %77 = vector.load %arg7[%c0_38, %c0_39, %c0_40] : memref<1x16x1xf32, #tpu.memory_space<vmem>>, vector<1x16x1xf32>
    %78 = vector.shape_cast %77 : vector<1x16x1xf32> to vector<16x1xf32>
    %79 = arith.extf %76 : vector<16x16xbf16> to vector<16x16xf32>
    %c168 = arith.constant 168 : index
    %c0_41 = arith.constant 0 : index
    %80 = vector.load %arg8[%c168, %c0_41] : memref<384x32xf32, #tpu.memory_space<vmem>>, vector<8x32xf32>
    %c176 = arith.constant 176 : index
    %c0_42 = arith.constant 0 : index
    %81 = vector.load %arg8[%c176, %c0_42] : memref<384x32xf32, #tpu.memory_space<vmem>>, vector<1x32xf32>
    %cst_43 = arith.constant dense<0.000000e+00> : vector<16x32xf32>
    %82 = tpu.matmul %74, %80, %cst_43 {dimension_numbers = #tpu.dot_dimension_numbers<[1], [0], [0], [1], [0, 0, 1, 1], [], []>} : vector<16x8xf32>, vector<8x32xf32>, vector<16x32xf32> -> vector<16x32xf32>
    %83 = vector.broadcast %81 : vector<1x32xf32> to vector<16x32xf32>
    %84 = arith.addf %82, %83 : vector<16x32xf32>
    %85 = vector.broadcast %78 : vector<16x1xf32> to vector<16x32xf32>
    %86 = arith.mulf %85, %84 : vector<16x32xf32>
    %cst_44 = arith.constant dense<0.000000e+00> : vector<16x32xf32>
    %87 = tpu.matmul %79, %86, %cst_44 {dimension_numbers = #tpu.dot_dimension_numbers<[1], [0], [0], [1], [0, 0, 1, 1], [], []>} : vector<16x16xf32>, vector<16x32xf32>, vector<16x32xf32> -> vector<16x32xf32>
    %88 = arith.addf %87, %86 : vector<16x32xf32>
    %89 = vector.broadcast %78 : vector<16x1xf32> to vector<16x32xf32>
    %90 = arith.mulf %89, %88 : vector<16x32xf32>
    %c184 = arith.constant 184 : index
    %c0_45 = arith.constant 0 : index
    %91 = vector.load %arg8[%c184, %c0_45] : memref<384x32xf32, #tpu.memory_space<vmem>>, vector<32x32xf32>
    %c280 = arith.constant 280 : index
    %c0_46 = arith.constant 0 : index
    %92 = vector.load %arg8[%c280, %c0_46] : memref<384x32xf32, #tpu.memory_space<vmem>>, vector<1x32xf32>
    %cst_47 = arith.constant dense<0.000000e+00> : vector<16x32xf32>
    %93 = tpu.matmul %90, %91, %cst_47 {dimension_numbers = #tpu.dot_dimension_numbers<[1], [0], [0], [1], [0, 0, 1, 1], [], []>} : vector<16x32xf32>, vector<32x32xf32>, vector<16x32xf32> -> vector<16x32xf32>
    %94 = vector.broadcast %92 : vector<1x32xf32> to vector<16x32xf32>
    %95 = arith.addf %93, %94 : vector<16x32xf32>
    %cst_48 = arith.constant 0.000000e+00 : f32
    %96 = vector.broadcast %cst_48 : f32 to vector<16x32xf32>
    %97 = arith.maximumf %95, %96 : vector<16x32xf32>
    %98 = vector.broadcast %78 : vector<16x1xf32> to vector<16x32xf32>
    %99 = arith.mulf %98, %97 : vector<16x32xf32>
    %cst_49 = arith.constant dense<0.000000e+00> : vector<16x32xf32>
    %100 = tpu.matmul %79, %99, %cst_49 {dimension_numbers = #tpu.dot_dimension_numbers<[1], [0], [0], [1], [0, 0, 1, 1], [], []>} : vector<16x16xf32>, vector<16x32xf32>, vector<16x32xf32> -> vector<16x32xf32>
    %101 = arith.addf %100, %99 : vector<16x32xf32>
    %102 = vector.broadcast %78 : vector<16x1xf32> to vector<16x32xf32>
    %103 = arith.mulf %102, %101 : vector<16x32xf32>
    %c216 = arith.constant 216 : index
    %c0_50 = arith.constant 0 : index
    %104 = vector.load %arg8[%c216, %c0_50] : memref<384x32xf32, #tpu.memory_space<vmem>>, vector<32x32xf32>
    %c288 = arith.constant 288 : index
    %c0_51 = arith.constant 0 : index
    %105 = vector.load %arg8[%c288, %c0_51] : memref<384x32xf32, #tpu.memory_space<vmem>>, vector<1x32xf32>
    %cst_52 = arith.constant dense<0.000000e+00> : vector<16x32xf32>
    %106 = tpu.matmul %103, %104, %cst_52 {dimension_numbers = #tpu.dot_dimension_numbers<[1], [0], [0], [1], [0, 0, 1, 1], [], []>} : vector<16x32xf32>, vector<32x32xf32>, vector<16x32xf32> -> vector<16x32xf32>
    %107 = vector.broadcast %105 : vector<1x32xf32> to vector<16x32xf32>
    %108 = arith.addf %106, %107 : vector<16x32xf32>
    %cst_53 = arith.constant 0.000000e+00 : f32
    %109 = vector.broadcast %cst_53 : f32 to vector<16x32xf32>
    %110 = arith.maximumf %108, %109 : vector<16x32xf32>
    %111 = vector.broadcast %78 : vector<16x1xf32> to vector<16x32xf32>
    %112 = arith.mulf %111, %110 : vector<16x32xf32>
    %cst_54 = arith.constant dense<0.000000e+00> : vector<16x32xf32>
    %113 = tpu.matmul %79, %112, %cst_54 {dimension_numbers = #tpu.dot_dimension_numbers<[1], [0], [0], [1], [0, 0, 1, 1], [], []>} : vector<16x16xf32>, vector<16x32xf32>, vector<16x32xf32> -> vector<16x32xf32>
    %114 = arith.addf %113, %112 : vector<16x32xf32>
    %115 = vector.broadcast %78 : vector<16x1xf32> to vector<16x32xf32>
    %116 = arith.mulf %115, %114 : vector<16x32xf32>
    %c248 = arith.constant 248 : index
    %c0_55 = arith.constant 0 : index
    %117 = vector.load %arg8[%c248, %c0_55] : memref<384x32xf32, #tpu.memory_space<vmem>>, vector<32x32xf32>
    %c296 = arith.constant 296 : index
    %c0_56 = arith.constant 0 : index
    %118 = vector.load %arg8[%c296, %c0_56] : memref<384x32xf32, #tpu.memory_space<vmem>>, vector<1x32xf32>
    %cst_57 = arith.constant dense<0.000000e+00> : vector<16x32xf32>
    %119 = tpu.matmul %116, %117, %cst_57 {dimension_numbers = #tpu.dot_dimension_numbers<[1], [0], [0], [1], [0, 0, 1, 1], [], []>} : vector<16x32xf32>, vector<32x32xf32>, vector<16x32xf32> -> vector<16x32xf32>
    %120 = vector.broadcast %118 : vector<1x32xf32> to vector<16x32xf32>
    %121 = arith.addf %119, %120 : vector<16x32xf32>
    %cst_58 = arith.constant dense<0.000000e+00> : vector<32xf32>
    %122 = vector.multi_reduction <add>, %121, %cst_58 [0] : vector<16x32xf32> to vector<32xf32>
    %123 = vector.shape_cast %122 : vector<32xf32> to vector<1x32xf32>
    %cst_59 = arith.constant 1.600000e+01 : f32
    %124 = vector.broadcast %cst_59 : f32 to vector<1x32xf32>
    %125 = arith.divf %123, %124 : vector<1x32xf32>
    %c304 = arith.constant 304 : index
    %c0_60 = arith.constant 0 : index
    %126 = vector.load %arg8[%c304, %c0_60] : memref<384x32xf32, #tpu.memory_space<vmem>>, vector<32x32xf32>
    %cst_61 = arith.constant dense<0.000000e+00> : vector<1x32xf32>
    %127 = tpu.matmul %125, %126, %cst_61 {dimension_numbers = #tpu.dot_dimension_numbers<[1], [0], [0], [1], [0, 0, 1, 1], [], []>} : vector<1x32xf32>, vector<32x32xf32>, vector<1x32xf32> -> vector<1x32xf32>
    %128 = math.tanh %127 : vector<1x32xf32>
    %129 = vector.broadcast %128 : vector<1x32xf32> to vector<16x32xf32>
    %130 = arith.mulf %121, %129 : vector<16x32xf32>
    %cst_62 = arith.constant dense<0.000000e+00> : vector<16xf32>
    %131 = vector.multi_reduction <add>, %130, %cst_62 [1] : vector<16x32xf32> to vector<16xf32>
    %132 = vector.shape_cast %131 : vector<16xf32> to vector<16x1xf32>
    %133 = arith.negf %132 : vector<16x1xf32>
    %134 = math.exp %133 : vector<16x1xf32>
    %cst_63 = arith.constant 1.000000e+00 : f32
    %135 = vector.broadcast %cst_63 : f32 to vector<16x1xf32>
    %136 = arith.addf %135, %134 : vector<16x1xf32>
    %137 = arith.divf %135, %136 : vector<16x1xf32>
    %138 = vector.broadcast %137 : vector<16x1xf32> to vector<16x32xf32>
    %139 = arith.mulf %138, %121 : vector<16x32xf32>
    %cst_64 = arith.constant dense<0.000000e+00> : vector<32xf32>
    %140 = vector.multi_reduction <add>, %139, %cst_64 [0] : vector<16x32xf32> to vector<32xf32>
    %141 = vector.shape_cast %140 : vector<32xf32> to vector<1x32xf32>
    %142 = arith.addf %125, %141 : vector<1x32xf32>
    %143 = vector.broadcast %142 : vector<1x32xf32> to vector<16x32xf32>
    %144 = arith.addf %121, %143 : vector<16x32xf32>
    %145 = arith.addf %144, %84 : vector<16x32xf32>
    %146 = arith.index_cast %arg0 : i32 to index
    %147 = memref.load %arg1[%146] : memref<2xi32, #tpu.memory_space<smem>>
    %148 = tpu.iota {dimensions = array<i32: 0>} : vector<8x1xi32>
    %149 = vector.broadcast %147 : i32 to vector<8x1xi32>
    %150 = arith.cmpi eq, %148, %149 : vector<8x1xi32>
    %151 = arith.extui %150 : vector<8x1xi1> to vector<8x1xi32>
    %152 = arith.sitofp %151 : vector<8x1xi32> to vector<8x1xf32>
    %153 = vector.broadcast %152 : vector<8x1xf32> to vector<8x32xf32>
    %154 = arith.mulf %153, %72 : vector<8x32xf32>
    %cst_65 = arith.constant dense<0.000000e+00> : vector<32xf32>
    %155 = vector.multi_reduction <add>, %154, %cst_65 [0] : vector<8x32xf32> to vector<32xf32>
    %156 = vector.shape_cast %155 : vector<32xf32> to vector<1x32xf32>
    %c336 = arith.constant 336 : index
    %c0_66 = arith.constant 0 : index
    %157 = vector.load %arg8[%c336, %c0_66] : memref<384x32xf32, #tpu.memory_space<vmem>>, vector<32x32xf32>
    %c368 = arith.constant 368 : index
    %c0_67 = arith.constant 0 : index
    %158 = vector.load %arg8[%c368, %c0_67] : memref<384x32xf32, #tpu.memory_space<vmem>>, vector<1x32xf32>
    %c376 = arith.constant 376 : index
    %c0_68 = arith.constant 0 : index
    %159 = vector.load %arg8[%c376, %c0_68] : memref<384x32xf32, #tpu.memory_space<vmem>>, vector<1x32xf32>
    %160 = vector.broadcast %69 : vector<1x32xf32> to vector<16x32xf32>
    %161 = arith.addf %145, %160 : vector<16x32xf32>
    %162 = vector.broadcast %156 : vector<1x32xf32> to vector<16x32xf32>
    %163 = arith.addf %161, %162 : vector<16x32xf32>
    %cst_69 = arith.constant dense<0.000000e+00> : vector<16x32xf32>
    %164 = tpu.matmul %163, %157, %cst_69 {dimension_numbers = #tpu.dot_dimension_numbers<[1], [0], [0], [1], [0, 0, 1, 1], [], []>} : vector<16x32xf32>, vector<32x32xf32>, vector<16x32xf32> -> vector<16x32xf32>
    %165 = vector.broadcast %158 : vector<1x32xf32> to vector<16x32xf32>
    %166 = arith.addf %164, %165 : vector<16x32xf32>
    %cst_70 = arith.constant 0.000000e+00 : f32
    %167 = vector.broadcast %cst_70 : f32 to vector<16x32xf32>
    %168 = arith.maximumf %166, %167 : vector<16x32xf32>
    %cst_71 = arith.constant dense<0.000000e+00> : vector<32xf32>
    %169 = vector.multi_reduction <add>, %168, %cst_71 [0] : vector<16x32xf32> to vector<32xf32>
    %170 = vector.shape_cast %169 : vector<32xf32> to vector<1x32xf32>
    %cst_72 = arith.constant 1.600000e+01 : f32
    %171 = vector.broadcast %cst_72 : f32 to vector<1x32xf32>
    %172 = arith.divf %170, %171 : vector<1x32xf32>
    %173 = arith.mulf %172, %159 : vector<1x32xf32>
    %cst_73 = arith.constant dense<0.000000e+00> : vector<1xf32>
    %174 = vector.multi_reduction <add>, %173, %cst_73 [1] : vector<1x32xf32> to vector<1xf32>
    %175 = vector.shape_cast %174 : vector<1xf32> to vector<1x1xf32>
    %176 = vector.shape_cast %175 : vector<1x1xf32> to vector<1x1xf32>
    %177 = vector.broadcast %176 : vector<1x1xf32> to vector<1x128xf32>
    %c0_74 = arith.constant 0 : index
    %c0_75 = arith.constant 0 : index
    %c0_76 = arith.constant 0 : index
    %178 = vector.load %arg9[%c0_74, %c0_75, %c0_76] : memref<1x1x128xf32, #tpu.memory_space<vmem>>, vector<1x1x128xf32>
    %179 = vector.shape_cast %178 : vector<1x1x128xf32> to vector<1x128xf32>
    %180 = vector.shape_cast %177 : vector<1x128xf32> to vector<1x1x128xf32>
    tpu.vector_store %arg9[%c0_74, %c0_75, %c0_76], %180 {strides = array<i32>} : memref<1x1x128xf32, #tpu.memory_space<vmem>>, vector<1x1x128xf32>,
    return
  }
  func.func @transform_0(%arg0: i32, %arg1: memref<2xi32, #tpu.memory_space<smem>>) -> (i32, i32, i32) {
    %c0_i32 = arith.constant 0 : i32
    %c0_i32_0 = arith.constant 0 : i32
    %c0_i32_1 = arith.constant 0 : i32
    return %arg0, %c0_i32, %c0_i32_0 : i32, i32, i32
  }
  func.func @transform_1(%arg0: i32, %arg1: memref<2xi32, #tpu.memory_space<smem>>) -> (i32, i32, i32) {
    %c0_i32 = arith.constant 0 : i32
    %c0_i32_0 = arith.constant 0 : i32
    %c0_i32_1 = arith.constant 0 : i32
    return %arg0, %c0_i32, %c0_i32_0 : i32, i32, i32
  }
  func.func @transform_2(%arg0: i32, %arg1: memref<2xi32, #tpu.memory_space<smem>>) -> (i32, i32, i32) {
    %c0_i32 = arith.constant 0 : i32
    %c0_i32_0 = arith.constant 0 : i32
    %c0_i32_1 = arith.constant 0 : i32
    return %arg0, %c0_i32, %c0_i32_0 : i32, i32, i32
  }
  func.func @transform_3(%arg0: i32, %arg1: memref<2xi32, #tpu.memory_space<smem>>) -> (i32, i32, i32) {
    %c0_i32 = arith.constant 0 : i32
    %c0_i32_0 = arith.constant 0 : i32
    %c0_i32_1 = arith.constant 0 : i32
    return %arg0, %c0_i32, %c0_i32_0 : i32, i32, i32
  }
  func.func @transform_4(%arg0: i32, %arg1: memref<2xi32, #tpu.memory_space<smem>>) -> (i32, i32, i32) {
    %c0_i32 = arith.constant 0 : i32
    %c0_i32_0 = arith.constant 0 : i32
    %c0_i32_1 = arith.constant 0 : i32
    return %arg0, %c0_i32, %c0_i32_0 : i32, i32, i32
  }
  func.func @transform_5(%arg0: i32, %arg1: memref<2xi32, #tpu.memory_space<smem>>) -> (i32, i32, i32) {
    %c0_i32 = arith.constant 0 : i32
    %c0_i32_0 = arith.constant 0 : i32
    %c0_i32_1 = arith.constant 0 : i32
    return %arg0, %c0_i32, %c0_i32_0 : i32, i32, i32
  }
  func.func @transform_6(%arg0: i32, %arg1: memref<2xi32, #tpu.memory_space<smem>>) -> (i32, i32) {
    %c0_i32 = arith.constant 0 : i32
    %c0_i32_0 = arith.constant 0 : i32
    %c0_i32_1 = arith.constant 0 : i32
    return %c0_i32, %c0_i32_0 : i32, i32
  }
  func.func @transform_7(%arg0: i32, %arg1: memref<2xi32, #tpu.memory_space<smem>>) -> (i32, i32, i32) {
    %c0_i32 = arith.constant 0 : i32
    %c0_i32_0 = arith.constant 0 : i32
    %c0_i32_1 = arith.constant 0 : i32
    return %arg0, %c0_i32, %c0_i32_0 : i32, i32, i32
  }
}

</mosaic_0001>

<bundles_post_ra>
// kernel: critic_forward.1
= control target key start
LH: loop header
LB: loop body
LE: loop exit
PB: predicated region body
PF: predicated region fallthrough
CT: control target
= control target key end

     0   :  { %s1301_s30 = smov [#allocation3]   ;;  %s1667_s0 = inlined_call_operand.vmem [shape: s32[2], index: 0, kind: input, shape index: {}]   ;;  %s1668_s1 = inlined_call_operand.vmem [shape: f32[2,8,8], index: 1, kind: input, shape index: {}]   ;;  %s1669_s2 = inlined_call_operand.vmem [shape: bf16[2,8,8], index: 2, kind: input, shape index: {}]   ;;  %s1670_s3 = inlined_call_operand.vmem [shape: f32[2,8,1], index: 3, kind: input, shape index: {}]   ;;  %s1671_s4 = inlined_call_operand.vmem [shape: f32[2,16,8], index: 4, kind: input, shape index: {}]   ;;  %s1672_s5 = inlined_call_operand.vmem [shape: bf16[2,16,16], index: 5, kind: input, shape index: {}]   ;;  %s1673_s6 = inlined_call_operand.vmem [shape: f32[2,16,1], index: 6, kind: input, shape index: {}]   ;;  %s1674_s7 = inlined_call_operand.vmem [shape: f32[384,32], index: 7, kind: input, shape index: {}]   ;;  %s1675_s8 = inlined_call_operand.vmem [shape: f32[2,1,128], index: 8, kind: output, shape index: {}]  }
   0x1   :  { %s14_s29 = sshll.u32 %s1667_s0, 4  ;;  %s15_s29 = int_to_ptr.vmem [resolvable:$true] %s14_s29 }
   0x2   :  { %17 = dma.vmem_to_smem %s15_s29, 16, %s1301_s30, [#allocation2] }
   0x3   :  { %1295 = dma.done.wait [#allocation2], 16 }
   0x4   :  { %1296 = vsyncadd [#allocation2], 4294967280 }
   0x5   :  { %20 = sfence }
   0x6   :  { %s1354_s9 = smov 0  }
   0x7 LB: > { %s1360_s10 = sadd.s32 4294967295, %s1299_s9   ;;  %p1187_p0 = scmp.ge.s32.totalorder %s1299_s9, 1  ;;  %s1299_s9 = sphi %s1354_s9, %s26_s9  }
   0x8   : > { %p293_p1 = scmp.lt.s32.totalorder %s1299_s9, 3 }
   0xa   : > { %p294_p2 = pnand %p1187_p0, %p293_p1 }
   0xb   : > { %p345_p3 = scmp.lt.s32.totalorder (!%p294_p2), %s1360_s10, 1 }
   0xc   : > { %297 = sbr.rel (%p294_p2) target bundleno = 2152 (0x868), region = 48 }
  0x11   : > { %v379_v0 = vld [vmem:[%s1674_s7] sm:$0xff]  ;;  %v1302_v1 = vmov 0   ;;  %s1369_s12 = scalar_select %p345_p3, %s1360_s10, 1  ;;  %vm382_vm0 = vcmask 64512   ;;  %v439_v5 = vld [vmem:[%s1674_s7 + $0x28] sm:$0xff]  ;;  %v437_v14 = vld [vmem:[%s1674_s7 + $0x18] sm:$0xff] }
  0x12   : > { %401 = vmatpush.msra.mxu0 %v379_v0  ;;  %1248 = vset.pattern.permute.xlu0 %v1302_v1  ;;  %v1250_v6 = vld [vmem:[%s1674_s7 + $0x8] ss:$0 sm:$0xff]  ;;  %v438_v13 = vld [vmem:[%s1674_s7 + $0x20] sm:$0xff]  ;;  %v436_v15 = vld [vmem:[%s1674_s7 + $0x10] sm:$0xff]  ;;  %vm442_vm1 = vcmask 261120   ;;  %vm700_vm2 = vcmask 130048  }
  0x13   : > { %1249 = vset.pattern.permute.xlu1 %v1302_v1  ;;  %s1372_s13 = sshll.u32 %s1369_s12, 3  ;;  %s1228_s20 = sshll.u32 %s1369_s12, 4  ;;  %v492_v19 = vld [vmem:[%s1674_s7 + $0x48] sm:$0xff]  ;;  %v1251_v20 = vld [vmem:[%s1674_s7 + $0x70] ss:$0 sm:$0xff]  ;;  %v491_v25 = vld [vmem:[%s1674_s7 + $0x40] sm:$0xff] }
  0x14   : > { %s348_s16 = scalar_lea.vmem %s1668_s1, %s1372_s13  ;;  %s356_s19 = scalar_lea.vmem %s1670_s3, %s1372_s13  ;;  %458 = vmatpush.msrb.mxu0 %v439_v5  ;;  %v490_v26 = vld [vmem:[%s1674_s7 + $0x38] sm:$0xff]  ;;  %v489_v27 = vld [vmem:[%s1674_s7 + $0x30] sm:$0xff]  ;;  %v656_v28 = vld [vmem:[%s1674_s7 + $0xa8] sm:$0xff] }
  0x15   : > { %v375_v2 = vld [vmem:[%s348_s16] sm:$0xff]  ;;  %s1389_s23 = scalar_lea.vmem %s1673_s6, %s1228_s20  ;;  %s1189_s26 = sshll.u32 %s1369_s12, 2  ;;  %v1252_v35 = vld [vmem:[%s1674_s7 + $0x78] ss:$0 sm:$0xff]  ;;  %v544_v37 = vld [vmem:[%s1674_s7 + $0x68] sm:$0xff] }
  0x16   : > { %1197 = vmatmul.msk.f32.vlgmr.msra.gmra.mxu0 %vm382_vm0, %v375_v2  ;;  %v377_v3 = vld [vmem:[%s356_s19] sm:$0xff]  ;;  %v653_v4 = vld [vmem:[%s1389_s23 + $0x8] sm:$0xff]  ;;  %s352_s29 = scalar_lea.vmem %s1669_s2, %s1189_s26  ;;  %s361_s16 = scalar_lea.vmem %s1671_s4, %s1228_s20  ;;  %v1253_v42 = vld [vmem:[%s1674_s7 + $0xb0] ss:$0 sm:$0xff] }
  0x17   : > { %408 = vperm.xlu0 %1248, %v377_v3   ;;  %v376_v7 = vld [vmem:[%s352_s29] sm:$0xf]  ;;  %459 = vmatpush.msrb.mxu0 %v438_v13  ;;  %v649_v34 = vld [vmem:[%s361_s16 + $0x8] sm:$0xff]  ;;  %s366_s25 = scalar_lea.vmem %s1672_s5, %s1372_s13  ;;  %v542_v54 = vld [vmem:[%s1674_s7 + $0x58] sm:$0xff]  ;;  %s1003_s13 = sld [smem:[#allocation3 + %s1360_s10]] }
  0x18   : > { %v378_v11 = vunpack.c.l.bf16 %v376_v7  ;;  %v652_v29 = vld [vmem:[%s1389_s23] sm:$0xff]  ;;  %v541_v55 = vld [vmem:[%s1674_s7 + $0x50] sm:$0xff]  ;;  %v734_v57 = vld [vmem:[%s1674_s7 + $0xc8] sm:$0xff]  ;;  %s374_s14 = scalar_lea.vmem %s1675_s8, %s1369_s12 }
  0x19   : > { %460 = vmatpush.msrb.mxu0 %v437_v14  ;;  %690 = vperm.xlu1 %1249, %v652_v29   ;;  %v648_v33 = vld [vmem:[%s361_s16] sm:$0xff]  ;;  %v735_v56 = vld [vmem:[%s1674_s7 + $0xd0] sm:$0xff]  ;;  %v732_v59 = vld [vmem:[%s1674_s7 + $0xb8] sm:$0xff] }
  0x1a   : > { %v1232_v44 = vld [vmem:[%s366_s25] sm:$0xff]   ;;  %v586_v7 = vld [vmem:[%s1674_s7 + $0x90] sm:$0xff]  ;;  %v1255_v29 = vld [vmem:[%s1674_s7 + $0x118] ss:$0 sm:$0xff] }
  0x1b   : > { %461 = vmatpush.msrb.mxu0 %v436_v15  ;;  %v1475_v50 = vunpack.c.l.bf16 %v1232_v44  ;;  %v1481_v52 = vunpack.c.h.bf16 %v1232_v44  ;;  %v543_v53 = vld [vmem:[%s1674_s7 + $0x60] sm:$0xff] }
  0x1c   : > { %v733_v58 = vld [vmem:[%s1674_s7 + $0xc0] sm:$0xff] }
  0x1d   : > { %510 = vmatpush.msra.mxu0 %v492_v19  ;;  %v588_v5 = vld [vmem:[%s1674_s7 + $0xa0] sm:$0xff] }
  0x1e   : > { %604 = vmatpush.msra.mxu2 %v588_v5  ;;  %v861_v5 = vld [vmem:[%s1674_s7 + $0x100] sm:$0xff] }
  0x1f   : > { %695 = vperm.xlu0 %1248, %v653_v4   ;;  %511 = vmatpush.msra.mxu0 %v491_v25 }
  0x21   : > { %512 = vmatpush.msra.mxu0 %v490_v26 }
  0x23   : > { %513 = vmatpush.msra.mxu0 %v489_v27 }
  0x89   : > { %v1404_v10 = vpop.permute.xlu0 %408 }
  0x8b   : > { %v1471_v48 = vpop.permute.xlu1 %690 }
  0x91   : > { %v1469_v47 = vpop.permute.xlu0 %695 }
  0x93   : > { %v403_v8 = vpop.f32.mrf.mxu0 }
  0x94   : > { %v1402_v9 = vadd.f32 %v1250_v6, %v403_v8  ;;  %v587_v6 = vld [vmem:[%s1674_s7 + $0x98] sm:$0xff]  ;;  %v585_v8 = vld [vmem:[%s1674_s7 + $0x88] sm:$0xff] }
  0x95   : > { %605 = vmatpush.msra.mxu2 %v587_v6  ;;  %v860_v6 = vld [vmem:[%s1674_s7 + $0xf8] sm:$0xff] }
  0x96   : > { %v411_v12 = vmul.f32 %v1404_v10, %v1402_v9 }
  0x97   : > { %606 = vmatpush.msra.mxu2 %v586_v7 }
  0x98   : > { %430 = vmatpush.msra.mxu1 %v411_v12 }
  0x99   : > { %1198 = vmatmul.msk.f32.vlgmr.msra.gmra.mxu1 %vm382_vm0, %v378_v11  ;;  %607 = vmatpush.msra.mxu2 %v585_v8 }
 0x116   : > { %v432_v16 = vpop.f32.mrf.mxu1 }
 0x117   : > { %v433_v17 = vadd.f32 %v432_v16, %v411_v12  ;;  %v1254_v12 = vld [vmem:[%s1674_s7 + $0x80] ss:$0 sm:$0xff] }
 0x119   : > { %v435_v18 = vmul.f32 %v433_v17, %v1404_v10 }
 0x11b   : > { %1199 = vmatmul.msk.f32.vlgmr.msrb.gmra.mxu0 %vm442_vm1, %v435_v18 }
 0x11c   : > { %680 = vmatpush.msrb.mxu0 %v656_v28 }
 0x198   : > { %v463_v21 = vpop.f32.mrf.mxu0 }
 0x199   : > { %v464_v22 = vadd.f32 %v1251_v20, %v463_v21 }
 0x19b   : > { %v466_v23 = vmax.f32 %v464_v22, 0.0 }
 0x19d   : > { %v467_v24 = vmul.f32 %v466_v23, %v1404_v10 }
 0x19f   : > { %483 = vmatpush.msra.mxu3 %v467_v24 }
 0x1a0   : > { %1200 = vmatmul.msk.f32.vlgmr.msra.gmra.mxu3 %vm382_vm0, %v378_v11 }
 0x1a1   : > { %562 = vmatpush.msrb.mxu3 %v544_v37  ;;  %v799_v37 = vld [vmem:[%s1674_s7 + $0xf0] sm:$0xff] }
 0x1a3   : > { %563 = vmatpush.msrb.mxu3 %v543_v53 }
 0x1a5   : > { %564 = vmatpush.msrb.mxu3 %v542_v54 }
 0x1a7   : > { %565 = vmatpush.msrb.mxu3 %v541_v55 }
 0x1a9   : > { %756 = vmatpush.msra.mxu3 %v735_v56 }
 0x1ab   : > { %757 = vmatpush.msra.mxu3 %v734_v57 }
 0x1ad   : > { %758 = vmatpush.msra.mxu3 %v733_v58  ;;  %v863_v58 = vld [vmem:[%s1674_s7 + $0x110] sm:$0xff] }
 0x1af   : > { %759 = vmatpush.msra.mxu3 %v732_v59 }
 0x223   : > { %v485_v30 = vpop.f32.mrf.mxu3 }
 0x224   : > { %v486_v31 = vadd.f32 %v485_v30, %v467_v24 }
 0x226   : > { %v488_v32 = vmul.f32 %v486_v31, %v1404_v10 }
 0x228   : > { %1201 = vmatmul.msk.f32.vlgmr.msra.gmra.mxu0 %vm442_vm1, %v488_v32 }
 0x229   : > { %820 = vmatpush.msra.mxu0 %v799_v37 }
 0x230   : > { %1206 = vmatmul.msk.f32.vlgmr.msrb.gmra.mxu0 %vm382_vm0, %v648_v33 }
 0x238   : > { %1207 = vmatmul.msk.f32.gmra.mxu0 %vm382_vm0, %v649_v34 }
 0x2a5   : > { %v515_v36 = vpop.f32.mrf.mxu0 }
 0x2a6   : > { %v516_v38 = vadd.f32 %v1252_v35, %v515_v36 }
 0x2a8   : > { %v518_v39 = vmax.f32 %v516_v38, 0.0  ;;  %v798_v38 = vld [vmem:[%s1674_s7 + $0xe8] sm:$0xff] }
 0x2a9   : > { %821 = vmatpush.msra.mxu0 %v798_v38 }
 0x2aa   : > { %v519_v40 = vmul.f32 %v518_v39, %v1404_v10  ;;  %v797_v39 = vld [vmem:[%s1674_s7 + $0xe0] sm:$0xff] }
 0x2ab   : > { %822 = vmatpush.msra.mxu0 %v797_v39 }
 0x2ac   : > { %535 = vmatpush.msrb.mxu1 %v519_v40 }
 0x2ad   : > { %1202 = vmatmul.msk.f32.vlgmr.msrb.gmra.mxu1 %vm382_vm0, %v378_v11  ;;  %v682_v41 = vpop.f32.mrf.mxu0 }
 0x2ae   : > { %v1465_v45 = vadd.f32 %v1253_v42, %v682_v41 }
 0x2b0   : > { %v698_v51 = vmul.f32 %v1471_v48, %v1465_v45 }
 0x2b5   : > { %v685_v43 = vpop.f32.mrf.mxu0 }
 0x2b6   : > { %v1467_v46 = vadd.f32 %v1253_v42, %v685_v43 }
 0x2b8   : > { %v699_v49 = vmul.f32 %v1469_v47, %v1467_v46 }
 0x2ba   : > { %721 = vmatpush.msra.mxu1 %v699_v49 }
 0x2bc   : > { %722 = vmatpush.msra.mxu1 %v698_v51 }
 0x2bd   : > { %1208 = vmatmul.msk.f32.vlgmr.msra.gmra.mxu1 %vm700_vm2, %v1475_v50 }
 0x2c5   : > { %1209 = vmatmul.msk.f32.gmra.mxu1 %vm700_vm2, %v1481_v52 }
 0x32a   : > { %v537_v60 = vpop.f32.mrf.mxu1 }
 0x32b   : > { %v538_v61 = vadd.f32 %v537_v60, %v519_v40  ;;  %v796_v40 = vld [vmem:[%s1674_s7 + $0xd8] sm:$0xff]  ;;  %v1256_v60 = vld [vmem:[%s1674_s7 + $0x120] ss:$0 sm:$0xff] }
 0x32c   : > { %823 = vmatpush.msra.mxu0 %v796_v40 }
 0x32d   : > { %v540_v62 = vmul.f32 %v538_v61, %v1404_v10  ;;  %v1303_v10 = vmov 8.0  }
 0x32e   : > { %1259 = vrcp.f32 %v1303_v10 }
 0x32f   : > { %1203 = vmatmul.msk.f32.vlgmr.msrb.gmra.mxu3 %vm442_vm1, %v540_v62 }
 0x330   : > { %884 = vmatpush.msrb.mxu3 %v863_v58 }
 0x334   : > { %v1260_v11 = vpop.eup %1259 }
 0x335   : > { %v578_v13 = vmul.f32 8.0, %v1260_v11  ;;  %vm582_vm3 = vweird.f32 %v1260_v11 }
 0x337   : > { %v579_v16 = vsub.f32 1.0, %v578_v13  ;;  %v914_v13 = vld [vmem:[%s1674_s7 + $0x140] sm:$0xff] }
 0x339   : > { %v580_v19 = vmul.f32 %v1260_v11, %v579_v16 }
 0x33a   : > { %v724_v63 = vpop.f32.mrf.mxu1 }
 0x33b   : > { %v725_v0 = vadd.f32 %v724_v63, %v698_v51  ;;  %v581_v22 = vadd.f32 %v1260_v11, %v580_v19 }
 0x33d   : > { %v730_v1 = vmul.f32 %v725_v0, %v1471_v48  ;;  %v583_v25 = vsel %vm582_vm3, %v1260_v11, %v581_v22  ;;  %vm1071_vm3 = vcmask 253952  }
 0x33f   : > { %1210 = vmatmul.msk.f32.vlgmr.msra.gmra.mxu3 %vm442_vm1, %v730_v1 }
 0x342   : > { %v727_v2 = vpop.f32.mrf.mxu1 }
 0x343   : > { %v728_v3 = vadd.f32 %v727_v2, %v699_v49 }
 0x345   : > { %v731_v4 = vmul.f32 %v728_v3, %v1469_v47 }
 0x347   : > { %1211 = vmatmul.msk.f32.gmra.mxu3 %vm442_vm1, %v731_v4  ;;  %v862_v4 = vld [vmem:[%s1674_s7 + $0x108] sm:$0xff] }
 0x348   : > { %885 = vmatpush.msrb.mxu3 %v862_v4 }
 0x34a   : > { %886 = vmatpush.msrb.mxu3 %v861_v5 }
 0x34c   : > { %887 = vmatpush.msrb.mxu3 %v860_v6 }
 0x3b2   : > { %v567_v14 = vpop.f32.mrf.mxu3 }
 0x3b3   : > { %v1527_v15 = vadd.f32 %v1254_v12, %v567_v14  ;;  %v915_v12 = vld [vmem:[%s1674_s7 + $0x148] sm:$0xff]  ;;  %v1304_v14 = vmov 16.0  }
 0x3b5   : > { %v570_v17 = vsel %vm442_vm1, %v1527_v15, 0.0 }
 0x3b6   : > { %v571_v18 = vrot.slane %v570_v17, 4 }
 0x3b8   : > { %v572_v20 = vadd.f32 %v571_v18, %v570_v17  ;;  %v1257_v17 = vld [vmem:[%s1674_s7 + $0x128] ss:$0 sm:$0xff] }
 0x3ba   : > { %v573_v21 = vrot.slane %v572_v20, 2 }
 0x3bc   : > { %v574_v23 = vadd.f32 %v573_v21, %v572_v20 }
 0x3be   : > { %v575_v24 = vrot.slane %v574_v23, 1 }
 0x3c0   : > { %v576_v26 = vadd.f32 %v575_v24, %v574_v23 }
 0x3c2   : > { %v761_v27 = vpop.f32.mrf.mxu3  ;;  %v1531_v28 = vmul.f32 %v583_v25, %v576_v26 }
 0x3c3   : > { %v762_v30 = vadd.f32 %v1255_v29, %v761_v27 }
 0x3c4   : > { %1204 = vmatmul.msk.f32.vlgmr.msra.gmra.mxu2 %vm442_vm1, %v1531_v28 }
 0x3c5   : > { %v767_v33 = vmax.f32 %v762_v30, 0.0 }
 0x3c7   : > { %v769_v36 = vmul.f32 %v767_v33, %v1471_v48 }
 0x3ca   : > { %v764_v31 = vpop.f32.mrf.mxu3 }
 0x3cb   : > { %v765_v32 = vadd.f32 %v1255_v29, %v764_v31 }
 0x3cd   : > { %v768_v34 = vmax.f32 %v765_v32, 0.0 }
 0x3cf   : > { %v770_v35 = vmul.f32 %v768_v34, %v1469_v47 }
 0x3d1   : > { %785 = vmatpush.msrb.mxu2 %v770_v35 }
 0x3d3   : > { %786 = vmatpush.msrb.mxu2 %v769_v36 }
 0x3d4   : > { %1212 = vmatmul.msk.f32.vlgmr.msrb.gmra.mxu2 %vm700_vm2, %v1475_v50 }
 0x3d5   : > { %931 = vmatpush.msra.mxu2 %v915_v12 }
 0x3d7   : > { %932 = vmatpush.msra.mxu2 %v914_v13  ;;  %v1021_v13 = vld [vmem:[%s1674_s7 + $0x168] sm:$0xff] }
 0x3dc   : > { %1213 = vmatmul.msk.f32.gmra.mxu2 %vm700_vm2, %v1481_v52 }
 0x447   : > { %v609_v41 = vpop.f32.mrf.mxu2 }
 0x448   : > { %1261 = vtanh.f32 %v609_v41 }
 0x449   : > { %1263 = vrcp.f32 %v1304_v14 }
 0x44e   : > { %v1262_v42 = vpop.eup %1261 }
 0x44f   : > { %v613_v43 = vperm.slane %v1262_v42, 0  ;;  %v1264_v18 = vpop.eup %1263 }
 0x450   : > { %v905_v20 = vmul.f32 16.0, %v1264_v18  ;;  %vm909_vm4 = vweird.f32 %v1264_v18 }
 0x451   : > { %v614_v44 = vmul.f32 %v613_v43, %v1527_v15 }
 0x452   : > { %v906_v25 = vsub.f32 1.0, %v905_v20  ;;  %v1018_v20 = vld [vmem:[%s1674_s7 + $0x150] sm:$0xff] }
 0x453   : > { %v615_v49 = vsel %vm442_vm1, %v614_v44, 0.0 }
 0x454   : > { %616 = vadd.xlane.f32.xlu1 %v615_v49  ;;  %v907_v29 = vmul.f32 %v1264_v18, %v906_v25 }
 0x456   : > { %v908_v32 = vadd.f32 %v1264_v18, %v907_v29  ;;  %v1006_v29 = vstv %s1003_s13 }
 0x457   : > { %v788_v51 = vpop.f32.mrf.mxu2 }
 0x458   : > { %v789_v53 = vadd.f32 %v788_v51, %v769_v36 }
 0x45a   : > { %v794_v54 = vmul.f32 %v789_v53, %v1471_v48 }
 0x45c   : > { %1214 = vmatmul.msk.f32.vlgmr.msra.gmra.mxu0 %vm442_vm1, %v794_v54 }
 0x45f   : > { %v791_v55 = vpop.f32.mrf.mxu2 }
 0x460   : > { %v792_v56 = vadd.f32 %v791_v55, %v770_v35  ;;  %v1610_v35 = vsel %vm909_vm4, %v1264_v18, %v908_v32 }
 0x462   : > { %v795_v57 = vmul.f32 %v792_v56, %v1469_v47 }
 0x464   : > { %1215 = vmatmul.msk.f32.gmra.mxu0 %vm442_vm1, %v795_v57 }
 0x4c7   : > { %v617_v49 = vpop.xlane.xlu1 %616 }
 0x4c8   : > { %v1205_v51 = vmul.f32 -1.442695, %v617_v49 }
 0x4d9   : > { %v825_v59 = vpop.f32.mrf.mxu0 }
 0x4da   : > { %v826_v61 = vadd.f32 %v1256_v60, %v825_v59 }
 0x4dc   : > { %v831_v0 = vmax.f32 %v826_v61, 0.0 }
 0x4de   : > { %v833_v3 = vmul.f32 %v831_v0, %v1471_v48 }
 0x4e1   : > { %v828_v62 = vpop.f32.mrf.mxu0 }
 0x4e2   : > { %v829_v63 = vadd.f32 %v1256_v60, %v828_v62 }
 0x4e4   : > { %v832_v1 = vmax.f32 %v829_v63, 0.0 }
 0x4e6   : > { %v834_v2 = vmul.f32 %v832_v1, %v1469_v47 }
 0x4e8   : > { %849 = vmatpush.msrb.mxu1 %v834_v2 }
 0x4ea   : > { %850 = vmatpush.msrb.mxu1 %v833_v3 }
 0x4eb   : > { %1216 = vmatmul.msk.f32.vlgmr.msrb.gmra.mxu1 %vm700_vm2, %v1475_v50 }
 0x4f3   : > { %1217 = vmatmul.msk.f32.gmra.mxu1 %vm700_vm2, %v1481_v52 }
 0x568   : > { %v852_v7 = vpop.f32.mrf.mxu1 }
 0x569   : > { %v853_v50 = vadd.f32 %v852_v7, %v833_v3 }
 0x56b   : > { %v858_v8 = vmul.f32 %v853_v50, %v1471_v48  ;;  %v913_v48 = vld [vmem:[%s1674_s7 + $0x138] sm:$0xff] }
 0x56c   : > { %933 = vmatpush.msra.mxu2 %v913_v48  ;;  %v1020_v48 = vld [vmem:[%s1674_s7 + $0x160] sm:$0xff] }
 0x56d   : > { %1218 = vmatmul.msk.f32.vlgmr.msrb.gmra.mxu3 %vm442_vm1, %v858_v8 }
 0x570   : > { %v855_v52 = vpop.f32.mrf.mxu1 }
 0x571   : > { %v856_v10 = vadd.f32 %v855_v52, %v834_v2 }
 0x573   : > { %v859_v11 = vmul.f32 %v856_v10, %v1469_v47  ;;  %v912_v47 = vld [vmem:[%s1674_s7 + $0x130] sm:$0xff] }
 0x574   : > { %934 = vmatpush.msra.mxu2 %v912_v47  ;;  %v1019_v47 = vld [vmem:[%s1674_s7 + $0x158] sm:$0xff] }
 0x575   : > { %1219 = vmatmul.msk.f32.gmra.mxu3 %vm442_vm1, %v859_v11 }
 0x576   : > { %1047 = vmatpush.msrb.mxu2 %v1021_v13 }
 0x578   : > { %1048 = vmatpush.msrb.mxu2 %v1020_v48 }
 0x57a   : > { %1049 = vmatpush.msrb.mxu2 %v1019_v47 }
 0x57c   : > { %1050 = vmatpush.msrb.mxu2 %v1018_v20 }
 0x5f0   : > { %v889_v16 = vpop.f32.mrf.mxu3 }
 0x5f1   : > { %v1602_v19 = vadd.f32 %v1257_v17, %v889_v16 }
 0x5f3   : > { %v895_v23 = vsel %vm442_vm1, %v1602_v19, 0.0 }
 0x5f8   : > { %v892_v21 = vpop.f32.mrf.mxu3 }
 0x5f9   : > { %v1604_v22 = vadd.f32 %v1257_v17, %v892_v21 }
 0x5fb   : > { %v896_v24 = vsel %vm442_vm1, %v1604_v22, 0.0 }
 0x5fc   : > { %v897_v26 = vadd.f32 %v896_v24, %v895_v23  ;;  %v1004_v23 = vlaneseq }
 0x5fe   : > { %v898_v27 = vrot.slane %v897_v26, 4 }
 0x600   : > { %v899_v30 = vadd.f32 %v898_v27, %v897_v26  ;;  %v1005_v27 = vshrl.u32 %v1004_v23, 7 }
 0x602   : > { %v900_v31 = vrot.slane %v899_v30, 2  ;;  %vm1007_vm11 = vcmp.eq.s32.totalorder %v1005_v27, %v1006_v29 }
 0x604   : > { %v901_v33 = vadd.f32 %v900_v31, %v899_v30 }
 0x606   : > { %v902_v34 = vrot.slane %v901_v33, 1 }
 0x608   : > { %v903_v36 = vadd.f32 %v902_v34, %v901_v33 }
 0x60a   : > { %v1613_v37 = vmul.f32 %v1610_v35, %v903_v36 }
 0x60c   : > { %1220 = vmatmul.msk.f32.vlgmr.msra.gmra.mxu2 %vm442_vm1, %v1613_v37 }
 0x68f   : > { %v936_v38 = vpop.f32.mrf.mxu2 }
 0x690   : > { %1265 = vtanh.f32 %v936_v38 }
 0x691   : > { %1267 = vpow2.f32 %v1205_v51 }
 0x696   : > { %v1266_v39 = vpop.eup %1265 }
 0x697   : > { %v940_v40 = vperm.slane %v1266_v39, 0  ;;  %v1268_v53 = vpop.eup %1267 }
 0x698   : > { %v621_v54 = vadd.f32 1.0, %v1268_v53 }
 0x699   : > { %v941_v41 = vmul.f32 %v940_v40, %v1602_v19  ;;  %v942_v43 = vmul.f32 %v940_v40, %v1604_v22 }
 0x69a   : > { %1269 = vrcp.f32 %v621_v54  ;;  %v633_v60 = vand.u32 2147483648, %v621_v54  ;;  %vm627_vm6 = vweird.f32 %v621_v54  ;;  %v631_v61 = vand.u32 2147483647, %v621_v54 }
 0x69b   : > { %v943_v42 = vsel %vm442_vm1, %v941_v41, 0.0  ;;  %v946_v44 = vsel %vm442_vm1, %v942_v43, 0.0 }
 0x69c   : > { %944 = vadd.xlane.f32.xlu2 %v943_v42  ;;  %v634_v63 = vor.u32 1.1754944e-38, %v633_v60  ;;  %vm632_vm8 = vcmp.eq.f32.partialorder %v631_v61, 8.507059e+37  ;;  %v1305_v42 = vmov 0.0  }
 0x69d   : > { %v1223_v43 = vsel %vm1007_vm11, 1.0, %v1305_v42 }
 0x6a0   : > { %v1270_v55 = vpop.eup %1269 }
 0x6a1   : > { %v623_v56 = vmul.f32 %v1270_v55, %v621_v54  ;;  %vm628_vm5 = vweird.f32 %v1270_v55 }
 0x6a2   : > { %vm629_vm7 = vmor %vm627_vm6, %vm628_vm5 }
 0x6a3   : > { %v624_v57 = vsub.f32 1.0, %v623_v56 }
 0x6a4   : > { %947 = vadd.xlane.f32.xlu2 %v946_v44 }
 0x6a5   : > { %v625_v58 = vmul.f32 %v1270_v55, %v624_v57 }
 0x6a7   : > { %v626_v59 = vadd.f32 %v1270_v55, %v625_v58 }
 0x6a9   : > { %v630_v62 = vsel %vm629_vm7, %v1270_v55, %v626_v59 }
 0x6aa   : > { %v635_v0 = vsel %vm632_vm8, %v634_v63, %v630_v62 }
 0x6ab   : > { %v637_v1 = vmul.f32 %v635_v0, %v1527_v15 }
 0x6ad   : > { %v638_v2 = vsel %vm442_vm1, %v637_v1, 0.0 }
 0x6ae   : > { %v639_v3 = vrot.slane %v638_v2, 4 }
 0x6b0   : > { %v640_v5 = vadd.f32 %v639_v3, %v638_v2 }
 0x6b2   : > { %v641_v7 = vrot.slane %v640_v5, 2 }
 0x6b4   : > { %v642_v10 = vadd.f32 %v641_v7, %v640_v5 }
 0x6b6   : > { %v643_v12 = vrot.slane %v642_v10, 1 }
 0x6b8   : > { %v644_v16 = vadd.f32 %v643_v12, %v642_v10 }
 0x6ba   : > { %v645_v25 = vadd.f32 %v644_v16, %v1531_v28 }
 0x6bc   : > { %v646_v31 = vadd.f32 %v645_v25, %v1527_v15 }
 0x6be   : > { %v647_v40 = vadd.f32 %v646_v31, %v1402_v9  ;;  %v1023_v31 = vld [vmem:[%s1674_s7 + $0x178] sm:$0x1] }
 0x6c0   : > { %v1010_v53 = vmul.f32 %v1223_v43, %v647_v40 }
 0x6c2   : > { %v1011_v58 = vsel %vm442_vm1, %v1010_v53, 0.0 }
 0x6c3   : > { %v1012_v62 = vrot.slane %v1011_v58, 4 }
 0x6c5   : > { %v1013_v1 = vadd.f32 %v1012_v62, %v1011_v58 }
 0x70f   : > { %v945_v4 = vpop.xlane.xlu2 %944 }
 0x710   : > { %v1221_v6 = vmul.f32 -1.442695, %v945_v4  ;;  %v1014_v4 = vrot.slane %v1013_v1, 2 }
 0x712   : > { %1271 = vpow2.f32 %v1221_v6  ;;  %v1015_v7 = vadd.f32 %v1014_v4, %v1013_v1 }
 0x717   : > { %v948_v50 = vpop.xlane.xlu2 %947 }
 0x718   : > { %v1272_v8 = vpop.eup %1271  ;;  %v1222_v52 = vmul.f32 -1.442695, %v948_v50 }
 0x719   : > { %v955_v11 = vadd.f32 1.0, %v1272_v8 }
 0x71a   : > { %1273 = vpow2.f32 %v1222_v52  ;;  %v1016_v52 = vrot.slane %v1015_v7, 1 }
 0x71b   : > { %1275 = vrcp.f32 %v955_v11  ;;  %v968_v33 = vand.u32 2147483648, %v955_v11  ;;  %vm962_vm10 = vweird.f32 %v955_v11  ;;  %v966_v34 = vand.u32 2147483647, %v955_v11 }
 0x71c   : > { %v1017_v12 = vadd.f32 %v1016_v52, %v1015_v7 }
 0x71d   : > { %v969_v41 = vor.u32 1.1754944e-38, %v968_v33  ;;  %vm967_vm13 = vcmp.eq.f32.partialorder %v966_v34, 8.507059e+37 }
 0x720   : > { %v1274_v14 = vpop.eup %1273 }
 0x721   : > { %v1276_v17 = vpop.eup %1275  ;;  %v956_v18 = vadd.f32 1.0, %v1274_v14 }
 0x722   : > { %v958_v21 = vmul.f32 %v1276_v17, %v955_v11  ;;  %vm963_vm9 = vweird.f32 %v1276_v17 }
 0x723   : > { %1277 = vrcp.f32 %v956_v18  ;;  %vm964_vm12 = vmor %vm962_vm10, %vm963_vm9  ;;  %v983_v28 = vand.u32 2147483648, %v956_v18  ;;  %v981_v49 = vand.u32 2147483647, %v956_v18  ;;  %vm977_vm15 = vweird.f32 %v956_v18 }
 0x724   : > { %v959_v24 = vsub.f32 1.0, %v958_v21 }
 0x725   : > { %v984_v54 = vor.u32 1.1754944e-38, %v983_v28  ;;  %vm982_vm2 = vcmp.eq.f32.partialorder %v981_v49, 8.507059e+37 }
 0x726   : > { %v960_v26 = vmul.f32 %v1276_v17, %v959_v24 }
 0x728   : > { %v961_v30 = vadd.f32 %v1276_v17, %v960_v26 }
 0x729   : > { %v1278_v32 = vpop.eup %1277 }
 0x72a   : > { %v973_v36 = vmul.f32 %v1278_v32, %v956_v18  ;;  %v965_v38 = vsel %vm964_vm12, %v1276_v17, %v961_v30  ;;  %vm978_vm14 = vweird.f32 %v1278_v32 }
 0x72b   : > { %v970_v15 = vsel %vm967_vm13, %v969_v41, %v965_v38  ;;  %vm979_vm0 = vmor %vm977_vm15, %vm978_vm14 }
 0x72c   : > { %v974_v39 = vsub.f32 1.0, %v973_v36  ;;  %v987_v55 = vmul.f32 %v970_v15, %v1602_v19 }
 0x72e   : > { %v975_v44 = vmul.f32 %v1278_v32, %v974_v39  ;;  %v989_v59 = vsel %vm442_vm1, %v987_v55, 0.0 }
 0x730   : > { %v976_v51 = vadd.f32 %v1278_v32, %v975_v44 }
 0x732   : > { %v980_v56 = vsel %vm979_vm0, %v1278_v32, %v976_v51 }
 0x733   : > { %v985_v57 = vsel %vm982_vm2, %v984_v54, %v980_v56 }
 0x734   : > { %v988_v9 = vmul.f32 %v985_v57, %v1604_v22 }
 0x736   : > { %v990_v60 = vsel %vm442_vm1, %v988_v9, 0.0 }
 0x737   : > { %v991_v61 = vadd.f32 %v990_v60, %v989_v59 }
 0x739   : > { %v992_v63 = vrot.slane %v991_v61, 4 }
 0x73b   : > { %v993_v0 = vadd.f32 %v992_v63, %v991_v61 }
 0x73d   : > { %v994_v2 = vrot.slane %v993_v0, 2 }
 0x73f   : > { %v995_v3 = vadd.f32 %v994_v2, %v993_v0 }
 0x741   : > { %v996_v5 = vrot.slane %v995_v3, 1 }
 0x743   : > { %v997_v6 = vadd.f32 %v996_v5, %v995_v3 }
 0x745   : > { %v998_v50 = vadd.f32 %v997_v6, %v1613_v37 }
 0x747   : > { %v999_v8 = vadd.f32 %v998_v50, %v1602_v19  ;;  %v1000_v11 = vadd.f32 %v998_v50, %v1604_v22  ;;  %v1258_v19 = vld [vmem:[%s1674_s7 + $0x170] ss:$0 sm:$0xff] }
 0x749   : > { %v1001_v10 = vadd.f32 %v999_v8, %v1465_v45  ;;  %v1002_v47 = vadd.f32 %v1000_v11, %v1467_v46 }
 0x74b   : > { %v1024_v13 = vadd.f32 %v1001_v10, %v645_v25  ;;  %v1025_v14 = vadd.f32 %v1002_v47, %v645_v25 }
 0x74d   : > { %v1026_v48 = vadd.f32 %v1024_v13, %v1017_v12  ;;  %v1027_v16 = vadd.f32 %v1025_v14, %v1017_v12 }
 0x74f   : > { %1224 = vmatmul.msk.f32.vlgmr.msrb.gmra.mxu2 %vm442_vm1, %v1026_v48 }
 0x757   : > { %1225 = vmatmul.msk.f32.gmra.mxu2 %vm442_vm1, %v1027_v16 }
 0x7d2   : > { %v1052_v17 = vpop.f32.mrf.mxu2 }
 0x7d3   : > { %v1053_v37 = vadd.f32 %v1258_v19, %v1052_v17 }
 0x7d5   : > { %v1058_v18 = vmax.f32 %v1053_v37, 0.0 }
 0x7d7   : > { %v1060_v21 = vsel %vm442_vm1, %v1058_v18, 0.0 }
 0x7da   : > { %v1055_v45 = vpop.f32.mrf.mxu2 }
 0x7db   : > { %v1056_v22 = vadd.f32 %v1258_v19, %v1055_v45 }
 0x7dd   : > { %v1059_v20 = vmax.f32 %v1056_v22, 0.0 }
 0x7df   : > { %v1061_v46 = vsel %vm442_vm1, %v1059_v20, 0.0 }
 0x7e0   : > { %v1062_v23 = vadd.f32 %v1061_v46, %v1060_v21 }
 0x7e2   : > { %v1063_v24 = vrot.slane %v1062_v23, 4 }
 0x7e4   : > { %v1064_v25 = vadd.f32 %v1063_v24, %v1062_v23 }
 0x7e6   : > { %v1065_v26 = vrot.slane %v1064_v25, 2 }
 0x7e8   : > { %v1066_v27 = vadd.f32 %v1065_v26, %v1064_v25 }
 0x7ea   : > { %v1067_v29 = vrot.slane %v1066_v27, 1 }
 0x7ec   : > { %v1068_v30 = vadd.f32 %v1067_v29, %v1066_v27 }
 0x7ee   : > { %v1069_v32 = vmul.f32 %v1068_v30, %v1610_v35 }
 0x7f0   : > { %v1070_v33 = vmul.f32 %v1069_v32, %v1023_v31 }
 0x7f2   : > { %v1072_v34 = vsel %vm1071_vm3, %v1070_v33, 0.0 }
 0x7f3   : > { %1073 = vadd.xlane.f32.xlu0 %v1072_v34 }
 0x866   : > { %v1074_v36 = vpop.xlane.xlu0 %1073 }
 0x867   : > { %1075 = vst [vmem:[%s374_s14] sm:$0x1] %v1074_v36 }
 0x868 PF: > { %s26_s9 = sadd.s32 1, %s1299_s9  }
 0x869   : > { %p23_p4 = scmp.ge.s32.totalorder %s26_s9, 4  }
 0x86b   :  { %25 = sbr.rel (!%p23_p4) target bundleno = 7 (0x7), region = 93 }

</bundles_post_ra>
